<compile_context>
chip_gen: v7x
topology: tpu7x:2x2x1
jax: 0.10.0
libtpu: 0.0.40
codegen_flags: <defaults>
</compile_context>

<pallas_src>
import functools

import jax
import jax.numpy as jnp
import numpy as np
from jax import lax
from jax.experimental import pallas as pl
from jax.experimental.pallas import tpu as pltpu


def _primes_in_range(lo, hi, count):
    """First `count` primes in [lo, hi) (replaces sympy.primerange)."""
    def is_prime(n):
        if n < 2:
            return False
        i = 2
        while i * i <= n:
            if n % i == 0:
                return False
            i += 1
        return True

    out, n = [], lo
    while len(out) < count and n < hi:
        if is_prime(n):
            out.append(n)
        n += 1
    assert len(out) == count, "not enough primes in range"
    return out


def _exact_mod(x, p):
    """Exact non-negative int32 modulo with an int32 (possibly traced) divisor.

    Two f32-division passes + a final +/-1 correction: exact for
    0 <= x < ~2**30 and 2 <= p < 2**23 (the wrapper asserts the hash argument
    range H*K^2 and the primes stay inside this window).
    """
    p = jnp.asarray(p, jnp.int32)
    pf = p.astype(jnp.float32)
    q = jnp.floor(x.astype(jnp.float32) / pf).astype(jnp.int32)
    r = x - q * p
    q = jnp.floor(r.astype(jnp.float32) / pf).astype(jnp.int32)
    r = r - q * p
    r = jnp.where(r < 0, r + p, r)
    r = jnp.where(r >= p, r - p, r)
    return r


def _vq_ngrammer_kernel(primes_ref, x_ref, means_ref, m2_ref, tbl_ref,
                        gn_ref, bn_ref, ge_ref, be_ref, mask_ref, out_ref,
                        *, num_clusters, ngram_vocab_size, dim_per_head,
                        ngram_emb_dim, eps, n_chunk, group):
    K, V = num_clusters, ngram_vocab_size
    D, E, G = dim_per_head, ngram_emb_dim, group
    N = x_ref.shape[1]
    num_chunks = N // n_chunk
    h = pl.program_id(0)                       # head index (grid axis 0)

    a = h + 1                                  # per-head multiplier/bias
    prime = primes_ref[h]                      # per-head prime from SMEM

    # Loop-invariant iotas, hoisted once (JAX does not CSE broadcast_in_dim).
    kiota = lax.broadcasted_iota(jnp.int32, (n_chunk, K), 1)
    row_iota = lax.broadcasted_iota(jnp.int32, (n_chunk, 1), 0)
    giota = lax.broadcasted_iota(jnp.int32, (n_chunk, V // G), 1)
    if G > 1:
        log2g = G.bit_length() - 1
        log2e = E.bit_length() - 1
        grp_of_lane = jnp.right_shift(
            lax.broadcasted_iota(jnp.int32, (n_chunk, G * E), 1), log2e)

    def chunk_body(c0, carry):
        """Process rows [c0, c0+n_chunk); carry = (1,1) prev-chunk last id."""
        xh = x_ref[0, pl.ds(c0, n_chunk), :]                      # (c, D) f32

        # ---- Vector quantization: argmin_k (||m_k||^2 - 2 x.m_k) ------------
        # ||x||^2 is row-constant and dropped; dot runs in bf16 (MXU-native),
        # accumulating in f32; ||m||^2 precomputed in f32 in the wrapper.
        dots = lax.dot_general(xh.astype(jnp.bfloat16), means_ref[0],
                               (((1,), (1,)), ((), ())),
                               preferred_element_type=jnp.float32)  # (c, K)
        dists = m2_ref[0] - 2.0 * dots
        dmin = jnp.min(dists, axis=-1, keepdims=True)
        ids = jnp.min(jnp.where(dists <= dmin, kiota, K),
                      axis=-1, keepdims=True)                       # (c, 1)

        # ---- Bigram ids: id[i] + id[i-1]*K (carry feeds row 0) ---------------
        # TODO(synk): segment_pos-based reset of the previous-token id not
        #             implemented (segment_pos=None path, the default call).
        prev = pltpu.roll(ids, shift=1, axis=0)
        prev = jnp.where(row_iota == 0, carry, prev)
        bigram = ids + prev * K                # unigram_vocab_size == K

        # ---- Multi-way hash: ((x*a + a) % prime) % V -------------------------
        hashed = _exact_mod(_exact_mod(bigram * a + a, prime), V)   # (c, 1)

        # ---- Ngram embedding lookup: grouped one-hot matmul ------------------
        # hashed = hi*G + lo; table row `hi` of the (V/G, G*E) layout holds the
        # G embeddings of that group along the lane axis; select block `lo`.
        if G > 1:
            hi = jnp.right_shift(hashed, log2g)
            lo = jnp.bitwise_and(hashed, G - 1)
        else:
            hi = hashed
        onehot = (giota == hi).astype(jnp.bfloat16)                 # (c, V/G)
        groups = jnp.dot(onehot, tbl_ref[0],
                         preferred_element_type=jnp.float32)        # (c, G*E)
        if G > 1:
            acc = jnp.where(grp_of_lane == lo, groups, 0.0)
            w = G * E
            while w > E:                       # log2(G) XLU roll-folds
                half = w // 2
                acc = acc + pltpu.roll(acc, shift=G * E - half, axis=1)
                w = half
            ng = acc[:, 0:E]                                        # (c, E)
        else:
            ng = groups                                             # (c, E)

        # ---- MultiheadLayerNorm of the ngram embeds --------------------------
        mu_n = jnp.mean(ng, axis=-1, keepdims=True)
        var_n = jnp.mean((ng - mu_n) ** 2, axis=-1, keepdims=True)
        inv_n = pl.reciprocal(jnp.sqrt(var_n) + eps, approx=True)
        ng_norm = (ng - mu_n) * inv_n * gn_ref[0] + bn_ref[0]       # (c, E)

        # ---- MultiheadLayerNorm of the input embeds --------------------------
        mu_e = jnp.mean(xh, axis=-1, keepdims=True)
        var_e = jnp.mean((xh - mu_e) ** 2, axis=-1, keepdims=True)
        inv_e = pl.reciprocal(jnp.sqrt(var_e) + eps, approx=True)
        x_norm = (xh - mu_e) * inv_e * ge_ref[0] + be_ref[0]        # (c, D)

        # ---- concat_ngrams=True: one full-block-width masked store -----------
        m = mask_ref[0, pl.ds(c0, n_chunk), :]                      # (c, 1)
        out_ref[0, pl.ds(c0, n_chunk), :] = (
            jnp.concatenate([x_norm[:, 0:D - E], ng_norm], axis=-1) * m)

        return ids[n_chunk - 1:n_chunk, :]     # (1,1) last cluster id

    zero_carry = jnp.zeros((1, 1), jnp.int32)
    if num_chunks == 1:
        chunk_body(0, zero_carry)
    else:
        def body(c, carry):
            c0 = pl.multiple_of(c * n_chunk, n_chunk)
            return chunk_body(c0, carry)
        lax.fori_loop(0, num_chunks, body, zero_carry)


def _pick_group(v, e):
    """Largest power-of-two G with G*E <= 128 and V % G == 0 (needs E pow2)."""
    if e <= 0 or (e & (e - 1)) != 0 or e > 128:
        return 1
    g = 1
    while g * 2 * e <= 128 and v % (g * 2) == 0:
        g *= 2
    return g


def _pick_chunk(n, bytes_per_row, budget_bytes):
    """Largest chunk (multiple of 8, dividing N) whose temporaries fit budget."""
    fallback = n
    for c in (1024, 512, 256, 128, 64, 32, 16, 8):
        if c <= n and n % c == 0:
            if c * bytes_per_row <= budget_bytes:
                return c
            fallback = c
    return fallback


def vq_ngrammer_forward(x, means, ngram_table, g_ngram, b_ngram, g_emb, b_emb,
                        mask=None, *, num_heads, dim_per_head, ngram_emb_dim,
                        num_clusters, ngram_vocab_size, primes, eps=1e-5):
    B, N, F = x.shape
    H, D, E = num_heads, dim_per_head, ngram_emb_dim
    K, V = num_clusters, ngram_vocab_size
    assert F == H * D
    assert D > E, "concat_ngrams=True requires dim_per_head > ngram_emb_dim"
    # _exact_mod validity range for the hash argument and the primes.
    assert H * K * K < (1 << 30), "hash argument would overflow the f32 modulo"
    assert int(max(primes)) < (1 << 23), "primes must be < 2**23"

    # Device-aware budgets (v7x: 64 MiB VMEM/TC; v5e/v6e: 128 MiB).
    try:
        vmem_cap = int(pltpu.get_tpu_info().vmem_capacity_bytes)
    except Exception:  # pragma: no cover - conservative fallback
        vmem_cap = 64 << 20

    G = _pick_group(V, E)
    chunk_budget = (2 << 20) if vmem_cap <= (64 << 20) else (4 << 20)
    bytes_per_row = (V // G) * 2 + 12 * K + 8 * G * E + 16 * D + 64
    n_chunk = _pick_chunk(N, bytes_per_row, chunk_budget)
    assert N % n_chunk == 0

    # Weight-derived constants, computed once outside the kernel.
    m2 = jnp.sum(means.astype(jnp.float32) ** 2, axis=-1)[:, None, :]  # (H,1,K)
    means_bf = means.astype(jnp.bfloat16)                              # (H,K,D)
    tbl = ngram_table.reshape(H, V // G, G * E).astype(jnp.bfloat16)   # grouped
    gn = g_ngram[:, None, :]                                           # (H,1,E)
    bn = b_ngram[:, None, :]
    ge = g_emb[:, None, :]                                             # (H,1,D)
    be = b_emb[:, None, :]
    primes_arr = jnp.asarray(primes, dtype=jnp.int32)                  # -> SMEM

    if mask is None:
        mask = jnp.ones((B, N), jnp.float32)
    mask3 = mask.astype(jnp.float32)[..., None]                        # (B,N,1)

    lane_aligned = (D % 128 == 0)
    if lane_aligned:
        # No HBM relayout: slice head columns straight out of (B, N, H*D) via a
        # lane-aligned BlockSpec and write back in the same lane-dense layout.
        x_in = x
        io_spec = pl.BlockSpec((1, N, D), lambda h, b, ps: (b, 0, h))
        out_shape = jax.ShapeDtypeStruct((B, N, H * D), jnp.float32)
    else:
        # TODO(synk): this relayout costs two extra HBM passes; a full-row
        # (1, N, H*D) block with an in-kernel head-column slice would avoid
        # them, but non-128-aligned dynamic lane slicing is avoided here for
        # lowering robustness.
        x_in = x.reshape(B, N, H, D).transpose(0, 2, 1, 3).reshape(B * H, N, D)
        io_spec = pl.BlockSpec((1, N, D), lambda h, b, ps: (b * H + h, 0, 0))
        out_shape = jax.ShapeDtypeStruct((B * H, N, D), jnp.float32)

    def head_spec(shape):
        return pl.BlockSpec(shape, lambda h, b, ps: (h, 0, 0))

    kernel = functools.partial(
        _vq_ngrammer_kernel, num_clusters=K, ngram_vocab_size=V,
        dim_per_head=D, ngram_emb_dim=E, eps=eps, n_chunk=n_chunk, group=G)

    # Rough per-step VMEM: double-buffered blocks + one chunk's temporaries,
    # clamped to ~70% of the device's physical VMEM.
    block_bytes = (2 * N * D * 4 + K * D * 2 + K * 4 + V * E * 2
                   + 2 * (E + D) * 4 + N * 4)
    vmem_bytes = 2 * block_bytes + n_chunk * bytes_per_row + (8 << 20)
    vmem_limit = int(min(max(vmem_bytes, 32 << 20), int(vmem_cap * 0.7)))

    out = pl.pallas_call(
        kernel,
        out_shape=out_shape,
        grid_spec=pltpu.PrefetchScalarGridSpec(
            num_scalar_prefetch=1,          # primes -> SMEM, indexed by head id
            grid=(H, B),                    # heads outer: per-head weights DMA'd once/head
            in_specs=[
                io_spec,                                  # x (per head/batch slab)
                head_spec((1, K, D)),                     # VQ means (bf16)
                head_spec((1, 1, K)),                     # ||means||^2 (f32)
                head_spec((1, V // G, G * E)),            # grouped ngram table (bf16)
                head_spec((1, 1, E)),                     # ngram LN gamma
                head_spec((1, 1, E)),                     # ngram LN beta
                head_spec((1, 1, D)),                     # embeds LN gamma
                head_spec((1, 1, D)),                     # embeds LN beta
                pl.BlockSpec((1, N, 1), lambda h, b, ps: (b, 0, 0)),   # mask
            ],
            out_specs=io_spec,
        ),
        compiler_params=pltpu.CompilerParams(
            dimension_semantics=("parallel", "parallel"),
            vmem_limit_bytes=vmem_limit),
    )(primes_arr, x_in, means_bf, m2, tbl, gn, bn, ge, be, mask3)

    if lane_aligned:
        return out
    return out.reshape(B, H, N, D).transpose(0, 2, 1, 3).reshape(B, N, H * D)


def _reference_forward(x, means, ngram_table, g_ngram, b_ngram, g_emb, b_emb,
                       mask, *, num_heads, dim_per_head, ngram_emb_dim,
                       num_clusters, ngram_vocab_size, primes, eps=1e-5,
                       vq_in_bf16=True):
    """Pure-JAX port of the PyTorch VQNgrammer forward (inference path).

    With vq_in_bf16=True the cluster assignment mirrors the kernel's precision
    (bf16 dots, row-constant ||x||^2 dropped) so argmin tie-breaks agree; the
    rest of the math is faithful f32 PyTorch semantics.
    """
    B, N, F = x.shape
    H, D, E = num_heads, dim_per_head, ngram_emb_dim
    K, V = num_clusters, ngram_vocab_size

    xh = x.reshape(B, N, H, D)
    if vq_in_bf16:
        dots = jnp.einsum('bnhd,hkd->bnhk', xh.astype(jnp.bfloat16),
                          means.astype(jnp.bfloat16),
                          preferred_element_type=jnp.float32)
        dists = jnp.sum(means.astype(jnp.float32) ** 2, -1)[None, None] - 2.0 * dots
    else:
        dists = (jnp.sum(xh * xh, -1)[..., None]
                 - 2.0 * jnp.einsum('bnhd,hkd->bnhk', xh, means)
                 + jnp.sum(means * means, -1)[None, None])
    cluster_ids = jnp.argmin(dists, axis=-1).astype(jnp.int32)      # (B, N, H)

    prev = jnp.pad(cluster_ids, ((0, 0), (1, 0), (0, 0)))[:, :-1]
    bigram = cluster_ids + prev * K                                 # (B, N, H)

    heads = jnp.arange(H, dtype=jnp.int32)
    a = heads + 1
    p = jnp.asarray(primes, dtype=jnp.int32)
    ngram_ids = ((bigram * a + a) % p) % V + V * heads              # (B, N, H)
    ng_emb = ngram_table[ngram_ids]                                 # (B, N, H, E)

    def mln(t, g, b):
        mu = jnp.mean(t, axis=-1, keepdims=True)
        std = jnp.sqrt(jnp.mean((t - mu) ** 2, axis=-1, keepdims=True))
        return (t - mu) / (std + eps) * g + b

    ng_norm = mln(ng_emb, g_ngram, b_ngram)
    x_norm = mln(xh, g_emb, b_emb)
    out = jnp.concatenate([x_norm[..., :D - E], ng_norm], axis=-1).reshape(B, N, H * D)
    if mask is not None:
        out = out * mask.astype(out.dtype)[..., None]
    return out


if __name__ == "__main__":
    # Small synthetic config consistent with VQNgrammer's constructor
    # constraints: ngram_vocab_size < num_clusters**2, dim_per_head > ngram_emb_dim.
    B, N = 2, 8
    num_heads = 2
    dim_per_head = 32
    ngram_emb_dim = 8
    num_clusters = 64
    ngram_vocab_size = 1024

    key = jax.random.PRNGKey(0)
    k_x, k_means, k_tbl = jax.random.split(key, 3)

    x = jax.random.normal(k_x, (B, N, num_heads * dim_per_head), dtype=jnp.float32)
    means = jax.random.normal(k_means, (num_heads, num_clusters, dim_per_head),
                              dtype=jnp.float32)
    ngram_table = jax.random.normal(
        k_tbl, (num_heads * ngram_vocab_size, ngram_emb_dim), dtype=jnp.float32)
    g_ngram = jnp.ones((num_heads, ngram_emb_dim), jnp.float32)
    b_ngram = jnp.zeros((num_heads, ngram_emb_dim), jnp.float32)
    g_emb = jnp.ones((num_heads, dim_per_head), jnp.float32)
    b_emb = jnp.zeros((num_heads, dim_per_head), jnp.float32)
    mask = jnp.ones((B, N), jnp.float32).at[1, -2:].set(0.0)

    # primes = sympy.primerange(ngram_vocab_size + 1, 2 * ngram_vocab_size)[:num_heads]
    primes = _primes_in_range(ngram_vocab_size + 1, 2 * ngram_vocab_size, num_heads)

    out = vq_ngrammer_forward(
        x, means, ngram_table, g_ngram, b_ngram, g_emb, b_emb, mask,
        num_heads=num_heads, dim_per_head=dim_per_head,
        ngram_emb_dim=ngram_emb_dim, num_clusters=num_clusters,
        ngram_vocab_size=ngram_vocab_size, primes=primes)
    jax.block_until_ready(out)

    assert out.shape == (B, N, num_heads * dim_per_head)
    assert out.dtype == jnp.float32

    # Loose-tolerance check vs a pure-JAX reference (bf16 table + approx
    # reciprocal introduce small, bounded perturbations; cluster assignment in
    # the reference mirrors the kernel's bf16 dot so tie-breaks agree).
    ref = _reference_forward(
        x, means, ngram_table, g_ngram, b_ngram, g_emb, b_emb, mask,
        num_heads=num_heads, dim_per_head=dim_per_head,
        ngram_emb_dim=ngram_emb_dim, num_clusters=num_clusters,
        ngram_vocab_size=ngram_vocab_size, primes=primes, vq_in_bf16=True)
    np.testing.assert_allclose(np.asarray(out), np.asarray(ref),
                               atol=8e-2, rtol=8e-2)

    print("KERNEL_OK")
</pallas_src>

<mosaic_0001>
module attributes {stable_mosaic.version = 11 : i64} {
  func.func @_vq_ngrammer_kernel(%arg0: i32, %arg1: i32, %arg2: memref<2xi32, #tpu.memory_space<smem>>, %arg3: memref<1x8x32xf32, #tpu.memory_space<vmem>>, %arg4: memref<1x64x32xbf16, #tpu.memory_space<vmem>>, %arg5: memref<1x1x64xf32, #tpu.memory_space<vmem>>, %arg6: memref<1x64x128xbf16, #tpu.memory_space<vmem>>, %arg7: memref<1x1x8xf32, #tpu.memory_space<vmem>>, %arg8: memref<1x1x8xf32, #tpu.memory_space<vmem>>, %arg9: memref<1x1x32xf32, #tpu.memory_space<vmem>>, %arg10: memref<1x1x32xf32, #tpu.memory_space<vmem>>, %arg11: memref<1x8x1xf32, #tpu.memory_space<vmem>>, %arg12: memref<1x8x32xf32, #tpu.memory_space<vmem>>) attributes {dimension_semantics = [#tpu.dimension_semantics<parallel>, #tpu.dimension_semantics<parallel>], iteration_bounds = array<i64: 2, 2>, scalar_prefetch = 1 : i64, scratch_operands = 0 : i64, tpu.core_type = #tpu.core_type<tc>, window_params = [{transform_indices = @transform_0, window_bounds = array<i64: 1, 8, 32>}, {transform_indices = @transform_1, window_bounds = array<i64: 1, 64, 32>}, {transform_indices = @transform_2, window_bounds = array<i64: 1, 1, 64>}, {transform_indices = @transform_3, window_bounds = array<i64: 1, 64, 128>}, {transform_indices = @transform_4, window_bounds = array<i64: 1, 1, 8>}, {transform_indices = @transform_5, window_bounds = array<i64: 1, 1, 8>}, {transform_indices = @transform_6, window_bounds = array<i64: 1, 1, 32>}, {transform_indices = @transform_7, window_bounds = array<i64: 1, 1, 32>}, {transform_indices = @transform_8, window_bounds = array<i64: 1, 8, 1>}, {transform_indices = @transform_9, window_bounds = array<i64: 1, 8, 32>}]} {
    %c1_i32 = arith.constant 1 : i32
    %0 = arith.addi %arg0, %c1_i32 : i32
    %1 = arith.index_cast %arg0 : i32 to index
    %2 = memref.load %arg2[%1] : memref<2xi32, #tpu.memory_space<smem>>
    %3 = tpu.iota {dimensions = array<i32: 1>} : vector<8x64xi32>
    %4 = tpu.iota {dimensions = array<i32: 0>} : vector<8x1xi32>
    %5 = tpu.iota {dimensions = array<i32: 1>} : vector<8x64xi32>
    %6 = tpu.iota {dimensions = array<i32: 1>} : vector<8x128xi32>
    %c3_i32 = arith.constant 3 : i32
    %7 = vector.broadcast %c3_i32 : i32 to vector<8x128xi32>
    %8 = arith.shrsi %6, %7 : vector<8x128xi32>
    %c0_i32 = arith.constant 0 : i32
    %9 = vector.broadcast %c0_i32 : i32 to vector<1x1xi32>
    %c0 = arith.constant 0 : index
    %c0_0 = arith.constant 0 : index
    %c0_1 = arith.constant 0 : index
    %10 = vector.load %arg3[%c0, %c0_0, %c0_1] : memref<1x8x32xf32, #tpu.memory_space<vmem>>, vector<1x8x32xf32>
    %11 = vector.shape_cast %10 : vector<1x8x32xf32> to vector<8x32xf32>
    %12 = arith.truncf %11 : vector<8x32xf32> to vector<8x32xbf16>
    %c0_2 = arith.constant 0 : index
    %c0_3 = arith.constant 0 : index
    %c0_4 = arith.constant 0 : index
    %13 = vector.load %arg4[%c0_2, %c0_3, %c0_4] : memref<1x64x32xbf16, #tpu.memory_space<vmem>>, vector<1x64x32xbf16>
    %14 = vector.shape_cast %13 : vector<1x64x32xbf16> to vector<64x32xbf16>
    %cst = arith.constant dense<0.000000e+00> : vector<8x64xf32>
    %15 = tpu.matmul %12, %14, %cst {dimension_numbers = #tpu.dot_dimension_numbers<[1], [1], [0], [0], [0, 0, 1, 0], [], []>} : vector<8x32xbf16>, vector<64x32xbf16>, vector<8x64xf32> -> vector<8x64xf32>
    %c0_5 = arith.constant 0 : index
    %c0_6 = arith.constant 0 : index
    %c0_7 = arith.constant 0 : index
    %16 = vector.load %arg5[%c0_5, %c0_6, %c0_7] : memref<1x1x64xf32, #tpu.memory_space<vmem>>, vector<1x1x64xf32>
    %17 = vector.shape_cast %16 : vector<1x1x64xf32> to vector<1x64xf32>
    %cst_8 = arith.constant 2.000000e+00 : f32
    %18 = vector.broadcast %cst_8 : f32 to vector<8x64xf32>
    %19 = arith.mulf %18, %15 : vector<8x64xf32>
    %20 = vector.broadcast %17 : vector<1x64xf32> to vector<8x64xf32>
    %21 = arith.subf %20, %19 : vector<8x64xf32>
    %cst_9 = arith.constant dense<0x7F800000> : vector<8xf32>
    %22 = vector.multi_reduction <minimumf>, %21, %cst_9 [1] : vector<8x64xf32> to vector<8xf32>
    %23 = vector.shape_cast %22 : vector<8xf32> to vector<8x1xf32>
    %24 = vector.broadcast %23 : vector<8x1xf32> to vector<8x64xf32>
    %25 = arith.cmpf ole, %21, %24 : vector<8x64xf32>
    %c64_i32 = arith.constant 64 : i32
    %26 = vector.broadcast %c64_i32 : i32 to vector<8x64xi32>
    %27 = arith.select %25, %3, %26 : vector<8x64xi1>, vector<8x64xi32>
    %cst_10 = arith.constant dense<2147483647> : vector<8xi32>
    %28 = vector.multi_reduction <minsi>, %27, %cst_10 [1] : vector<8x64xi32> to vector<8xi32>
    %29 = vector.shape_cast %28 : vector<8xi32> to vector<8x1xi32>
    %c1_i32_11 = arith.constant 1 : i32
    %30 = tpu.dynamic_rotate %29 by %c1_i32_11 dim 0 : vector<8x1xi32>, i32 -> vector<8x1xi32>
    %c0_i32_12 = arith.constant 0 : i32
    %31 = vector.broadcast %c0_i32_12 : i32 to vector<8x1xi32>
    %32 = arith.cmpi eq, %4, %31 : vector<8x1xi32>
    %33 = vector.shape_cast %9 : vector<1x1xi32> to vector<1x1xi32>
    %34 = vector.broadcast %33 : vector<1x1xi32> to vector<8x1xi32>
    %35 = arith.select %32, %34, %30 : vector<8x1xi1>, vector<8x1xi32>
    %c64_i32_13 = arith.constant 64 : i32
    %36 = vector.broadcast %c64_i32_13 : i32 to vector<8x1xi32>
    %37 = arith.muli %35, %36 : vector<8x1xi32>
    %38 = arith.addi %29, %37 : vector<8x1xi32>
    %39 = vector.broadcast %0 : i32 to vector<8x1xi32>
    %40 = arith.muli %38, %39 : vector<8x1xi32>
    %41 = vector.broadcast %0 : i32 to vector<8x1xi32>
    %42 = arith.addi %40, %41 : vector<8x1xi32>
    %43 = arith.sitofp %2 : i32 to f32
    %44 = arith.sitofp %42 : vector<8x1xi32> to vector<8x1xf32>
    %45 = vector.broadcast %43 : f32 to vector<8x1xf32>
    %46 = arith.divf %44, %45 : vector<8x1xf32>
    %47 = math.floor %46 : vector<8x1xf32>
    %48 = arith.fptosi %47 : vector<8x1xf32> to vector<8x1xi32>
    %49 = vector.broadcast %2 : i32 to vector<8x1xi32>
    %50 = arith.muli %48, %49 : vector<8x1xi32>
    %51 = arith.subi %42, %50 : vector<8x1xi32>
    %52 = arith.sitofp %51 : vector<8x1xi32> to vector<8x1xf32>
    %53 = vector.broadcast %43 : f32 to vector<8x1xf32>
    %54 = arith.divf %52, %53 : vector<8x1xf32>
    %55 = math.floor %54 : vector<8x1xf32>
    %56 = arith.fptosi %55 : vector<8x1xf32> to vector<8x1xi32>
    %57 = vector.broadcast %2 : i32 to vector<8x1xi32>
    %58 = arith.muli %56, %57 : vector<8x1xi32>
    %59 = arith.subi %51, %58 : vector<8x1xi32>
    %c0_i32_14 = arith.constant 0 : i32
    %60 = vector.broadcast %c0_i32_14 : i32 to vector<8x1xi32>
    %61 = arith.cmpi slt, %59, %60 : vector<8x1xi32>
    %62 = vector.broadcast %2 : i32 to vector<8x1xi32>
    %63 = arith.addi %59, %62 : vector<8x1xi32>
    %64 = arith.select %61, %63, %59 : vector<8x1xi1>, vector<8x1xi32>
    %65 = vector.broadcast %2 : i32 to vector<8x1xi32>
    %66 = arith.cmpi sge, %64, %65 : vector<8x1xi32>
    %67 = vector.broadcast %2 : i32 to vector<8x1xi32>
    %68 = arith.subi %64, %67 : vector<8x1xi32>
    %69 = arith.select %66, %68, %64 : vector<8x1xi1>, vector<8x1xi32>
    %70 = arith.sitofp %69 : vector<8x1xi32> to vector<8x1xf32>
    %cst_15 = arith.constant 1.024000e+03 : f32
    %71 = vector.broadcast %cst_15 : f32 to vector<8x1xf32>
    %72 = arith.divf %70, %71 : vector<8x1xf32>
    %73 = math.floor %72 : vector<8x1xf32>
    %74 = arith.fptosi %73 : vector<8x1xf32> to vector<8x1xi32>
    %c1024_i32 = arith.constant 1024 : i32
    %75 = vector.broadcast %c1024_i32 : i32 to vector<8x1xi32>
    %76 = arith.muli %74, %75 : vector<8x1xi32>
    %77 = arith.subi %69, %76 : vector<8x1xi32>
    %78 = arith.sitofp %77 : vector<8x1xi32> to vector<8x1xf32>
    %cst_16 = arith.constant 1.024000e+03 : f32
    %79 = vector.broadcast %cst_16 : f32 to vector<8x1xf32>
    %80 = arith.divf %78, %79 : vector<8x1xf32>
    %81 = math.floor %80 : vector<8x1xf32>
    %82 = arith.fptosi %81 : vector<8x1xf32> to vector<8x1xi32>
    %c1024_i32_17 = arith.constant 1024 : i32
    %83 = vector.broadcast %c1024_i32_17 : i32 to vector<8x1xi32>
    %84 = arith.muli %82, %83 : vector<8x1xi32>
    %85 = arith.subi %77, %84 : vector<8x1xi32>
    %c0_i32_18 = arith.constant 0 : i32
    %86 = vector.broadcast %c0_i32_18 : i32 to vector<8x1xi32>
    %87 = arith.cmpi slt, %85, %86 : vector<8x1xi32>
    %c1024_i32_19 = arith.constant 1024 : i32
    %88 = vector.broadcast %c1024_i32_19 : i32 to vector<8x1xi32>
    %89 = arith.addi %85, %88 : vector<8x1xi32>
    %90 = arith.select %87, %89, %85 : vector<8x1xi1>, vector<8x1xi32>
    %c1024_i32_20 = arith.constant 1024 : i32
    %91 = vector.broadcast %c1024_i32_20 : i32 to vector<8x1xi32>
    %92 = arith.cmpi sge, %90, %91 : vector<8x1xi32>
    %c1024_i32_21 = arith.constant 1024 : i32
    %93 = vector.broadcast %c1024_i32_21 : i32 to vector<8x1xi32>
    %94 = arith.subi %90, %93 : vector<8x1xi32>
    %95 = arith.select %92, %94, %90 : vector<8x1xi1>, vector<8x1xi32>
    %c4_i32 = arith.constant 4 : i32
    %96 = vector.broadcast %c4_i32 : i32 to vector<8x1xi32>
    %97 = arith.shrsi %95, %96 : vector<8x1xi32>
    %c15_i32 = arith.constant 15 : i32
    %98 = vector.broadcast %c15_i32 : i32 to vector<8x1xi32>
    %99 = arith.andi %95, %98 : vector<8x1xi32>
    %100 = vector.broadcast %97 : vector<8x1xi32> to vector<8x64xi32>
    %101 = arith.cmpi eq, %5, %100 : vector<8x64xi32>
    %102 = arith.extui %101 : vector<8x64xi1> to vector<8x64xi32>
    %103 = arith.sitofp %102 : vector<8x64xi32> to vector<8x64xf32>
    %104 = arith.truncf %103 : vector<8x64xf32> to vector<8x64xbf16>
    %c0_22 = arith.constant 0 : index
    %c0_23 = arith.constant 0 : index
    %c0_24 = arith.constant 0 : index
    %105 = vector.load %arg6[%c0_22, %c0_23, %c0_24] : memref<1x64x128xbf16, #tpu.memory_space<vmem>>, vector<1x64x128xbf16>
    %106 = vector.shape_cast %105 : vector<1x64x128xbf16> to vector<64x128xbf16>
    %cst_25 = arith.constant dense<0.000000e+00> : vector<8x128xf32>
    %107 = tpu.matmul %104, %106, %cst_25 {dimension_numbers = #tpu.dot_dimension_numbers<[1], [0], [0], [1], [0, 0, 1, 1], [], []>} : vector<8x64xbf16>, vector<64x128xbf16>, vector<8x128xf32> -> vector<8x128xf32>
    %108 = vector.broadcast %99 : vector<8x1xi32> to vector<8x128xi32>
    %109 = arith.cmpi eq, %8, %108 : vector<8x128xi32>
    %cst_26 = arith.constant 0.000000e+00 : f32
    %110 = vector.broadcast %cst_26 : f32 to vector<8x128xf32>
    %111 = arith.select %109, %107, %110 : vector<8x128xi1>, vector<8x128xf32>
    %c64_i32_27 = arith.constant 64 : i32
    %112 = tpu.dynamic_rotate %111 by %c64_i32_27 dim 1 : vector<8x128xf32>, i32 -> vector<8x128xf32>
    %113 = arith.addf %111, %112 : vector<8x128xf32>
    %c96_i32 = arith.constant 96 : i32
    %114 = tpu.dynamic_rotate %113 by %c96_i32 dim 1 : vector<8x128xf32>, i32 -> vector<8x128xf32>
    %115 = arith.addf %113, %114 : vector<8x128xf32>
    %c112_i32 = arith.constant 112 : i32
    %116 = tpu.dynamic_rotate %115 by %c112_i32 dim 1 : vector<8x128xf32>, i32 -> vector<8x128xf32>
    %117 = arith.addf %115, %116 : vector<8x128xf32>
    %c120_i32 = arith.constant 120 : i32
    %118 = tpu.dynamic_rotate %117 by %c120_i32 dim 1 : vector<8x128xf32>, i32 -> vector<8x128xf32>
    %119 = arith.addf %117, %118 : vector<8x128xf32>
    %120 = vector.extract_strided_slice %119 {offsets = [0, 0], sizes = [8, 8], strides = [1, 1]} : vector<8x128xf32> to vector<8x8xf32>
    %cst_28 = arith.constant dense<0.000000e+00> : vector<8xf32>
    %121 = vector.multi_reduction <add>, %120, %cst_28 [1] : vector<8x8xf32> to vector<8xf32>
    %122 = vector.shape_cast %121 : vector<8xf32> to vector<8x1xf32>
    %cst_29 = arith.constant 8.000000e+00 : f32
    %123 = vector.broadcast %cst_29 : f32 to vector<8x1xf32>
    %124 = arith.divf %122, %123 : vector<8x1xf32>
    %125 = vector.broadcast %124 : vector<8x1xf32> to vector<8x8xf32>
    %126 = arith.subf %120, %125 : vector<8x8xf32>
    %127 = arith.mulf %126, %126 : vector<8x8xf32>
    %cst_30 = arith.constant dense<0.000000e+00> : vector<8xf32>
    %128 = vector.multi_reduction <add>, %127, %cst_30 [1] : vector<8x8xf32> to vector<8xf32>
    %129 = vector.shape_cast %128 : vector<8xf32> to vector<8x1xf32>
    %cst_31 = arith.constant 8.000000e+00 : f32
    %130 = vector.broadcast %cst_31 : f32 to vector<8x1xf32>
    %131 = arith.divf %129, %130 : vector<8x1xf32>
    %132 = math.sqrt %131 : vector<8x1xf32>
    %cst_32 = arith.constant 9.99999974E-6 : f32
    %133 = vector.broadcast %cst_32 : f32 to vector<8x1xf32>
    %134 = arith.addf %132, %133 : vector<8x1xf32>
    %135 = tpu.reciprocal %134 {approx = true} : vector<8x1xf32> -> vector<8x1xf32>
    %136 = vector.broadcast %124 : vector<8x1xf32> to vector<8x8xf32>
    %137 = arith.subf %120, %136 : vector<8x8xf32>
    %138 = vector.broadcast %135 : vector<8x1xf32> to vector<8x8xf32>
    %139 = arith.mulf %137, %138 : vector<8x8xf32>
    %c0_33 = arith.constant 0 : index
    %c0_34 = arith.constant 0 : index
    %c0_35 = arith.constant 0 : index
    %140 = vector.load %arg7[%c0_33, %c0_34, %c0_35] : memref<1x1x8xf32, #tpu.memory_space<vmem>>, vector<1x1x8xf32>
    %141 = vector.shape_cast %140 : vector<1x1x8xf32> to vector<1x8xf32>
    %142 = vector.broadcast %141 : vector<1x8xf32> to vector<8x8xf32>
    %143 = arith.mulf %139, %142 : vector<8x8xf32>
    %c0_36 = arith.constant 0 : index
    %c0_37 = arith.constant 0 : index
    %c0_38 = arith.constant 0 : index
    %144 = vector.load %arg8[%c0_36, %c0_37, %c0_38] : memref<1x1x8xf32, #tpu.memory_space<vmem>>, vector<1x1x8xf32>
    %145 = vector.shape_cast %144 : vector<1x1x8xf32> to vector<1x8xf32>
    %146 = vector.broadcast %145 : vector<1x8xf32> to vector<8x8xf32>
    %147 = arith.addf %143, %146 : vector<8x8xf32>
    %cst_39 = arith.constant dense<0.000000e+00> : vector<8xf32>
    %148 = vector.multi_reduction <add>, %11, %cst_39 [1] : vector<8x32xf32> to vector<8xf32>
    %149 = vector.shape_cast %148 : vector<8xf32> to vector<8x1xf32>
    %cst_40 = arith.constant 3.200000e+01 : f32
    %150 = vector.broadcast %cst_40 : f32 to vector<8x1xf32>
    %151 = arith.divf %149, %150 : vector<8x1xf32>
    %152 = vector.broadcast %151 : vector<8x1xf32> to vector<8x32xf32>
    %153 = arith.subf %11, %152 : vector<8x32xf32>
    %154 = arith.mulf %153, %153 : vector<8x32xf32>
    %cst_41 = arith.constant dense<0.000000e+00> : vector<8xf32>
    %155 = vector.multi_reduction <add>, %154, %cst_41 [1] : vector<8x32xf32> to vector<8xf32>
    %156 = vector.shape_cast %155 : vector<8xf32> to vector<8x1xf32>
    %cst_42 = arith.constant 3.200000e+01 : f32
    %157 = vector.broadcast %cst_42 : f32 to vector<8x1xf32>
    %158 = arith.divf %156, %157 : vector<8x1xf32>
    %159 = math.sqrt %158 : vector<8x1xf32>
    %cst_43 = arith.constant 9.99999974E-6 : f32
    %160 = vector.broadcast %cst_43 : f32 to vector<8x1xf32>
    %161 = arith.addf %159, %160 : vector<8x1xf32>
    %162 = tpu.reciprocal %161 {approx = true} : vector<8x1xf32> -> vector<8x1xf32>
    %163 = vector.broadcast %151 : vector<8x1xf32> to vector<8x32xf32>
    %164 = arith.subf %11, %163 : vector<8x32xf32>
    %165 = vector.broadcast %162 : vector<8x1xf32> to vector<8x32xf32>
    %166 = arith.mulf %164, %165 : vector<8x32xf32>
    %c0_44 = arith.constant 0 : index
    %c0_45 = arith.constant 0 : index
    %c0_46 = arith.constant 0 : index
    %167 = vector.load %arg9[%c0_44, %c0_45, %c0_46] : memref<1x1x32xf32, #tpu.memory_space<vmem>>, vector<1x1x32xf32>
    %168 = vector.shape_cast %167 : vector<1x1x32xf32> to vector<1x32xf32>
    %169 = vector.broadcast %168 : vector<1x32xf32> to vector<8x32xf32>
    %170 = arith.mulf %166, %169 : vector<8x32xf32>
    %c0_47 = arith.constant 0 : index
    %c0_48 = arith.constant 0 : index
    %c0_49 = arith.constant 0 : index
    %171 = vector.load %arg10[%c0_47, %c0_48, %c0_49] : memref<1x1x32xf32, #tpu.memory_space<vmem>>, vector<1x1x32xf32>
    %172 = vector.shape_cast %171 : vector<1x1x32xf32> to vector<1x32xf32>
    %173 = vector.broadcast %172 : vector<1x32xf32> to vector<8x32xf32>
    %174 = arith.addf %170, %173 : vector<8x32xf32>
    %c0_50 = arith.constant 0 : index
    %c0_51 = arith.constant 0 : index
    %c0_52 = arith.constant 0 : index
    %175 = vector.load %arg11[%c0_50, %c0_51, %c0_52] : memref<1x8x1xf32, #tpu.memory_space<vmem>>, vector<1x8x1xf32>
    %176 = vector.shape_cast %175 : vector<1x8x1xf32> to vector<8x1xf32>
    %177 = vector.extract_strided_slice %174 {offsets = [0, 0], sizes = [8, 24], strides = [1, 1]} : vector<8x32xf32> to vector<8x24xf32>
    %178 = tpu.concatenate %177, %147 in 1 : vector<8x24xf32>, vector<8x8xf32> -> vector<8x32xf32>
    %179 = vector.broadcast %176 : vector<8x1xf32> to vector<8x32xf32>
    %180 = arith.mulf %178, %179 : vector<8x32xf32>
    %c0_53 = arith.constant 0 : index
    %c0_54 = arith.constant 0 : index
    %c0_55 = arith.constant 0 : index
    %181 = vector.load %arg12[%c0_53, %c0_54, %c0_55] : memref<1x8x32xf32, #tpu.memory_space<vmem>>, vector<1x8x32xf32>
    %182 = vector.shape_cast %181 : vector<1x8x32xf32> to vector<8x32xf32>
    %183 = vector.shape_cast %180 : vector<8x32xf32> to vector<1x8x32xf32>
    tpu.vector_store %arg12[%c0_53, %c0_54, %c0_55], %183 {strides = array<i32>} : memref<1x8x32xf32, #tpu.memory_space<vmem>>, vector<1x8x32xf32>,
    return
  }
  func.func @transform_0(%arg0: i32, %arg1: i32, %arg2: memref<2xi32, #tpu.memory_space<smem>>) -> (i32, i32, i32) {
    %c2_i32 = arith.constant 2 : i32
    %0 = arith.muli %arg1, %c2_i32 : i32
    %1 = arith.addi %0, %arg0 : i32
    %c0_i32 = arith.constant 0 : i32
    %c0_i32_0 = arith.constant 0 : i32
    %c0_i32_1 = arith.constant 0 : i32
    return %1, %c0_i32, %c0_i32_0 : i32, i32, i32
  }
  func.func @transform_1(%arg0: i32, %arg1: i32, %arg2: memref<2xi32, #tpu.memory_space<smem>>) -> (i32, i32, i32) {
    %c0_i32 = arith.constant 0 : i32
    %c0_i32_0 = arith.constant 0 : i32
    %c0_i32_1 = arith.constant 0 : i32
    return %arg0, %c0_i32, %c0_i32_0 : i32, i32, i32
  }
  func.func @transform_2(%arg0: i32, %arg1: i32, %arg2: memref<2xi32, #tpu.memory_space<smem>>) -> (i32, i32, i32) {
    %c0_i32 = arith.constant 0 : i32
    %c0_i32_0 = arith.constant 0 : i32
    %c0_i32_1 = arith.constant 0 : i32
    return %arg0, %c0_i32, %c0_i32_0 : i32, i32, i32
  }
  func.func @transform_3(%arg0: i32, %arg1: i32, %arg2: memref<2xi32, #tpu.memory_space<smem>>) -> (i32, i32, i32) {
    %c0_i32 = arith.constant 0 : i32
    %c0_i32_0 = arith.constant 0 : i32
    %c0_i32_1 = arith.constant 0 : i32
    return %arg0, %c0_i32, %c0_i32_0 : i32, i32, i32
  }
  func.func @transform_4(%arg0: i32, %arg1: i32, %arg2: memref<2xi32, #tpu.memory_space<smem>>) -> (i32, i32, i32) {
    %c0_i32 = arith.constant 0 : i32
    %c0_i32_0 = arith.constant 0 : i32
    %c0_i32_1 = arith.constant 0 : i32
    return %arg0, %c0_i32, %c0_i32_0 : i32, i32, i32
  }
  func.func @transform_5(%arg0: i32, %arg1: i32, %arg2: memref<2xi32, #tpu.memory_space<smem>>) -> (i32, i32, i32) {
    %c0_i32 = arith.constant 0 : i32
    %c0_i32_0 = arith.constant 0 : i32
    %c0_i32_1 = arith.constant 0 : i32
    return %arg0, %c0_i32, %c0_i32_0 : i32, i32, i32
  }
  func.func @transform_6(%arg0: i32, %arg1: i32, %arg2: memref<2xi32, #tpu.memory_space<smem>>) -> (i32, i32, i32) {
    %c0_i32 = arith.constant 0 : i32
    %c0_i32_0 = arith.constant 0 : i32
    %c0_i32_1 = arith.constant 0 : i32
    return %arg0, %c0_i32, %c0_i32_0 : i32, i32, i32
  }
  func.func @transform_7(%arg0: i32, %arg1: i32, %arg2: memref<2xi32, #tpu.memory_space<smem>>) -> (i32, i32, i32) {
    %c0_i32 = arith.constant 0 : i32
    %c0_i32_0 = arith.constant 0 : i32
    %c0_i32_1 = arith.constant 0 : i32
    return %arg0, %c0_i32, %c0_i32_0 : i32, i32, i32
  }
  func.func @transform_8(%arg0: i32, %arg1: i32, %arg2: memref<2xi32, #tpu.memory_space<smem>>) -> (i32, i32, i32) {
    %c0_i32 = arith.constant 0 : i32
    %c0_i32_0 = arith.constant 0 : i32
    %c0_i32_1 = arith.constant 0 : i32
    return %arg1, %c0_i32, %c0_i32_0 : i32, i32, i32
  }
  func.func @transform_9(%arg0: i32, %arg1: i32, %arg2: memref<2xi32, #tpu.memory_space<smem>>) -> (i32, i32, i32) {
    %c2_i32 = arith.constant 2 : i32
    %0 = arith.muli %arg1, %c2_i32 : i32
    %1 = arith.addi %0, %arg0 : i32
    %c0_i32 = arith.constant 0 : i32
    %c0_i32_0 = arith.constant 0 : i32
    %c0_i32_1 = arith.constant 0 : i32
    return %1, %c0_i32, %c0_i32_0 : i32, i32, i32
  }
}

</mosaic_0001>

<bundles_post_ra>
// kernel: tpu_custom_call.1
= control target key start
LH: loop header
LB: loop body
LE: loop exit
PB: predicated region body
PF: predicated region fallthrough
CT: control target
= control target key end

     0   :  { %s1606_s0 = inlined_call_operand.vmem [shape: s32[2], index: 0, kind: input, shape index: {}]   ;;  %s1607_s1 = inlined_call_operand.vmem [shape: f32[4,8,32], index: 1, kind: input, shape index: {}]   ;;  %s1608_s2 = inlined_call_operand.vmem [shape: bf16[2,64,32], index: 2, kind: input, shape index: {}]   ;;  %s1609_s3 = inlined_call_operand.vmem [shape: f32[2,1,64], index: 3, kind: input, shape index: {}]   ;;  %s1610_s4 = inlined_call_operand.vmem [shape: bf16[2,64,128], index: 4, kind: input, shape index: {}]   ;;  %s1611_s5 = inlined_call_operand.vmem [shape: f32[2,1,8], index: 5, kind: input, shape index: {}]   ;;  %s1612_s6 = inlined_call_operand.vmem [shape: f32[2,1,8], index: 6, kind: input, shape index: {}]   ;;  %s1613_s7 = inlined_call_operand.vmem [shape: f32[2,1,32], index: 7, kind: input, shape index: {}]   ;;  %s1614_s8 = inlined_call_operand.vmem [shape: f32[2,1,32], index: 8, kind: input, shape index: {}]   ;;  %s1615_s9 = inlined_call_operand.vmem [shape: f32[2,8,1], index: 9, kind: input, shape index: {}]   ;;  %s1616_s10 = inlined_call_operand.hbm [shape: f32[4,8,32], index: 10, kind: output, shape index: {}]  }
   0x1   :  { %1620 = sst [smem:[#allocation10_spill]] %s1608_s2  ;;  %s15_s15 = sshll.u32 %s1606_s0, 4  ;;  %s16_s15 = int_to_ptr.vmem [resolvable:$true] %s15_s15 }
   0x2   :  { %s1209_s16 = scalar_lea.vmem %s16_s15, 16  ;;  %p1214_p1 = scmp.lt.s32.totalorder %s16_s15, %s16_s15 }
   0x3   :  { %p1210_p0 = scmp.ne.s32.totalorder %s16_s15, %s1209_s16  ;;  %p1215_p2 = scmp.lt.s32.totalorder %s1209_s16, %s1209_s16 }
   0x5   :  { %p1216_p3 = por %p1215_p2, %p1214_p1 }
   0x7   :  { %p1217_p4 = pnand %p1216_p3, %p1210_p0 }
   0x9   :  { %1220 = shalt.err (!%p1217_p4)  }
   0xa   :  { %s1319_s17 = smov [#allocation3]  }
   0xb   :  { %18 = dma.vmem_to_smem %s16_s15, 16, %s1319_s17, [#allocation2] }
   0xc   :  { %1281 = dma.done.wait [#allocation2], 16 }
   0xd   :  { %1282 = vsyncadd [#allocation2], 4294967280 }
   0xe   :  { %20 = sfence }
   0xf   :  { %21 = vsyncpa [#allocation5], 0 }
  0x10   :  { %23 = vsyncpa [#allocation5 + $0x1], 0  ;;  %s1387_s18 = smov 0   ;;  %s1389_s19 = smov 0  }
  0x11   :  { %s1391_s0 = smov 0   ;;  %s1393_s20 = smov 0  }
  0x12   :  { %s1395_s21 = smov 0   ;;  %s1397_s22 = smov 0  }
  0x13   :  { %s1399_s23 = smov 0   ;;  %s1401_s24 = smov 0  }
  0x14 LB: > { %s1026_s25 = sadd.s32 4294967295, %s1317_s24   ;;  %s1027_s26 = sadd.s32 4294967294, %s1317_s24   ;;  %s1317_s24 = sphi %s1401_s24, %s29_s24   ;;  %s1313_s23 = sphi %s1399_s23, %s1635_s23   ;;  %s1309_s22 = sphi %s1397_s22, %s1634_s22   ;;  %s1305_s21 = sphi %s1395_s21, %s1633_s21   ;;  %s1301_s20 = sphi %s1393_s20, %s1632_s20   ;;  %s1297_s0 = sphi %s1391_s0, %s1631_s0   ;;  %s1293_s19 = sphi %s1389_s19, %s1630_s19   ;;  %s1289_s18 = sphi %s1387_s18, %s1629_s18  }
  0x15   : > { %s38_s27 = sadd.s32 1, %s1309_s22  ;;  %s41_s28 = sadd.s32 1, %s1313_s23 }
  0x16   : > { %p39_p5 = scmp.ge.s32.totalorder %s38_s27, 2  ;;  %s1030_s29 = sshll.u32 %s1309_s22, 1 }
  0x17   : > { %s284_s30 = sadd.s32 %s1313_s23, %s1030_s29  ;;  %s290_s11 = sadd.s32 1, %s1297_s0 }
  0x18   : > { %s1637_s27 = smov (%p39_p5, %s38_s27), 0  ;;  %s1639_s28 = smov (!%p39_p5, %s41_s28), %s1313_s23 }
  0x19   : > { %1621 = sst [smem:[#allocation8_spill]] %s1637_s27  ;;  %s1031_s12 = sshll.u32 %s1637_s27, 1 }
  0x1a   : > { %p300_p6 = scmp.ne.s32.totalorder %s1297_s0, %s1293_s19  ;;  %p43_p7 = scmp.ge.s32.totalorder %s1639_s28, 2 }
  0x1b   : > { %p301_p8 = scmp.eq.s32.totalorder %s1026_s25, 3  ;;  %p306_p9 = scmp.ne.s32.totalorder %s1293_s19, %s1289_s18 }
  0x1c   : > { %p307_p10 = scmp.eq.s32.totalorder %s1027_s26, 3  ;;  %s1641_s28 = smov (%p43_p7, %s1639_s28), 0 }
  0x1d   : > { %1622 = sst [smem:[#allocation9_spill]] %s1641_s28  ;;  %p1444_p11 = por %p301_p8, %p300_p6 }
  0x1e   : > { %p1448_p12 = por %p307_p10, %p306_p9  ;;  %s286_s15 = sadd.s32 %s1031_s12, %s1641_s28 }
  0x1f   : > { %p1034_p13 = scmp.ge.s32.totalorder %s1317_s24, 1  ;;  %s287_s16 = ssub.s32 %s284_s30, %s286_s15 }
  0x20   : > { %p389_p0 = scmp.lt.s32.totalorder %s1317_s24, 5  ;;  %p288_p1 = scmp.eq.s32.totalorder %s287_s16, 0 }
  0x22   : > { %p390_p2 = pnand %p1034_p13, %p389_p0 }
  0x23   : > { %s1456_s17 = scalar_select %p288_p1, %s1297_s0, %s290_s11  }
  0x24   : > { %393 = sbr.rel (%p390_p2) target bundleno = 2090 (0x82a), region = 56  ;;  %p463_p3 = scmp.lt.s32.totalorder (!%p390_p2), %s1305_s21, 1  ;;  %v1320_v0 = vmov (!%p390_p2), 0.0   ;;  %vm1321_vm0 = vmmov (!%p390_p2), 0   ;;  %vm532_vm1 = vcmask (!%p390_p2), 261120   ;;  %vm597_vm2 = vcmask (!%p390_p2), 523264  }
  0x25   : > { %1077 = vmatprep.subr.bf16.mxu0 (!%p390_p2), %v1320_v0  ;;  %1085 = vmatprep.mubr.msk.bf16.mxu0 (!%p390_p2), %vm1321_vm0, %v1320_v0  ;;  %s1625_s2 = sld [smem:[#allocation10_spill]] (!%p390_p2)  ;;  %s1036_s12 = sshll.u32 (!%p390_p2), %s1301_s20, 1  ;;  %v497_v19 = vlaneseq (!%p390_p2)  ;;  %v1322_v30 = vmov (!%p390_p2), 0   ;;  %vm768_vm12 = vcmask (!%p390_p2), 64512  }
  0x26   : > { %1089 = vmatprep.subr.bf16.mxu1 (!%p390_p2), %v1320_v0  ;;  %1097 = vmatprep.mubr.msk.bf16.mxu1 (!%p390_p2), %vm1321_vm0, %v1320_v0  ;;  %s1477_s15 = sadd.s32 (!%p390_p2), %s1305_s21, %s1036_s12  ;;  %s1324_s30 = smov (!%p390_p2), 96  }
  0x27   : > { %p457_p4 = scmp.lt.s32.totalorder (!%p390_p2), %s1477_s15, 3  ;;  %v1498_v20 = vand.u32 (!%p390_p2), 127, %v497_v19  ;;  %1190 = vset.pattern.permute.xlu0 (!%p390_p2), %v1322_v30  ;;  %1189 = vset.pattern.permute.xlu1 (!%p390_p2), %v1322_v30  ;;  %v500_v35 = vshrl.u32 (!%p390_p2), %v497_v19, 7  ;;  %s1325_s12 = smov (!%p390_p2), 112  }
  0x28   : > { %p488_p5 = scmp.lt.s32.totalorder (!%p390_p2), %s1301_s20, 1 }
  0x29   : > { %vm619_vm5 = vcmp.eq.s32.totalorder (!%p390_p2), %v500_v35, 0 }
  0x2b   : > { %s1462_s25 = scalar_select %p463_p3, %s1305_s21, 1 }
  0x2c   : > { %s458_s16 = scalar_select %p457_p4, %s1477_s15, 3 }
  0x2d   : > { %s1617_s26 = sshll.u32 %s1462_s25, 5  ;;  %s470_s27 = scalar_lea.vmem %s1609_s3, %s1462_s25 }
  0x2e   : > { %s467_s11 = scalar_lea.vmem %s1625_s2, %s1617_s26  ;;  %s1037_s29 = sshll.u32 %s458_s16, 3  ;;  %v1048_v12 = vld [vmem:[%s470_s27] ss:$0 sm:$0xff] }
  0x2f   : > { %v1191_v1 = vld [vmem:[%s467_s11] sm:$0xff]   ;;  %v1192_v3 = vld [vmem:[%s467_s11 + $0x8] sm:$0xff]   ;;  %v1193_v5 = vld [vmem:[%s467_s11 + $0x10] sm:$0xff]   ;;  %s460_s26 = scalar_lea.vmem %s1607_s1, %s1037_s29  ;;  %s1626_s2 = sshll.u32 %s1462_s25, 5 }
  0x30   : > { %v537_v2 = vsel %vm532_vm1, %v1191_v1, 0  ;;  %v540_v4 = vsel %vm532_vm1, %v1192_v3, 0  ;;  %v543_v6 = vsel %vm532_vm1, %v1193_v5, 0  ;;  %v1194_v7 = vld [vmem:[%s467_s11 + $0x18] sm:$0xff]   ;;  %v1488_v9 = vld [vmem:[%s460_s26] sm:$0xff]  ;;  %s1507_s26 = scalar_lea.vmem %s1610_s4, %s1626_s2  ;;  %s496_s11 = sld [smem:[#allocation3 + %s1305_s21]] }
  0x31   : > { %1078 = vmatpush3.bf16.xpose.msra.mxu0 %v537_v2  ;;  %v546_v8 = vsel %vm532_vm1, %v1194_v7, 0  ;;  %v503_v10 = vpack.c.bf16 %v1488_v9, %v1488_v9  ;;  %v1195_v31 = vld [vmem:[%s1507_s26] sm:$0xff]   ;;  %v1196_v32 = vld [vmem:[%s1507_s26 + $0x8] sm:$0xff]   ;;  %v1197_v33 = vld [vmem:[%s1507_s26 + $0x10] sm:$0xff]   ;;  %s495_s29 = sadd.s32 1, %s1305_s21  ;;  %s1323_s21 = smov 64  }
  0x32   : > { %1079 = vmatprep.subr.bf16.mxu0 %v1320_v0  ;;  %1090 = vmatpush3.bf16.msra.mxu1 %v1195_v31  ;;  %v623_v44 = vstv %s495_s29  ;;  %v501_v31 = vshra.s32 %v1498_v20, 3  ;;  %s1326_s2 = smov 120   ;;  %s1643_s20 = smov (!%p488_p5, %s1301_s20), 1 }
  0x33   : > { %1091 = vmatprep.subr.bf16.mxu1 %v1320_v0  ;;  %s1042_s27 = sshll.u32 %s1643_s20, 3  ;;  %s478_s29 = scalar_lea.vmem %s1611_s5, %s1462_s25 }
  0x34   : > { %s1328_s20 = smov [#allocation4]  }
  0x36   : > { %1092 = vmatpush3.bf16.msra.mxu1 %v1196_v32  ;;  %s626_s16 = scvt.s32.f32 %s496_s11  ;;  %v633_v53 = vstv %s496_s11  ;;  %s491_s11 = scalar_lea.vmem %s1615_s9, %s1042_s27 }
  0x37   : > { %1093 = vmatprep.subr.bf16.mxu1 %v1320_v0 }
  0x38   : > { %v628_v39 = vstv %s626_s16  ;;  %s1225_s16 = sshll.u32 %s1328_s20, 4  ;;  %s1226_s16 = int_to_ptr.vmem [resolvable:$false] %s1225_s16 }
  0x39   : > { %1080 = vmatpush3.bf16.xpose.msra.mxu0 %v540_v4  ;;  %1199 = vrcp.f32 %v628_v39 }
  0x3a   : > { %1081 = vmatprep.subr.bf16.mxu0 %v1320_v0  ;;  %1094 = vmatpush3.bf16.msra.mxu1 %v1197_v33 }
  0x3b   : > { %1095 = vmatprep.subr.bf16.mxu1 %v1320_v0 }
  0x41   : > { %1082 = vmatpush3.bf16.xpose.msra.mxu0 %v543_v6 }
  0x42   : > { %1083 = vmatprep.subr.bf16.mxu0 %v1320_v0 }
  0x43   : > { %v1200_v48 = vpop.eup %1199 }
  0x49   : > { %1084 = vmatpush3.bf16.xpose.msra.mxu0 %v546_v8 }
  0x50   : > { %1086 = vmatmul.mubr.msk.bf16.vlgmr.msra.gmra.mrb[0].mxu0 %vm532_vm1, %v503_v10 }
 0x123   : > { %v582_v11 = vpop.f32.mrb[0].mxu0 }
 0x124   : > { %v589_v13 = vmul.f32 2.0, %v582_v11  ;;  %v1087_v14 = vpop.f32.mrb[1].mxu0 }
 0x125   : > { %v585_v15 = vpop.f32.mrb[2].mxu0 }
 0x126   : > { %v1088_v16 = vpop.f32.mrb[3].mxu0  ;;  %v596_v17 = vsub.f32 %v1048_v12, %v589_v13 }
 0x128   : > { %v598_v18 = vsel %vm597_vm2, %v596_v17, inf }
 0x129   : > { %599 = vmin.xlane.f32.xlu0 %v598_v18 }
 0x1b6   : > { %v600_v21 = vpop.xlane.xlu0 %599 }
 0x1b7   : > { %vm601_vm3 = vcmp.le.f32.partialorder %v596_v17, %v600_v21 }
 0x1b8   : > { %v602_v22 = vsel %vm601_vm3, %v1498_v20, 64 }
 0x1b9   : > { %v603_v23 = vsel %vm597_vm2, %v602_v22, 2147483647 }
 0x1ba   : > { %v605_v24 = vshra.s32 %v603_v23, 16  ;;  %v604_v26 = vand.u32 65535, %v603_v23 }
 0x1bc   : > { %v607_v25 = vcvt.s32.f32 %v605_v24  ;;  %v606_v28 = vcvt.s32.f32 %v604_v26 }
 0x1be   : > { %608 = vmin.xlane.f32.xlu0 %v607_v25 }
 0x24b   : > { %v609_v27 = vpop.xlane.xlu0 %608 }
 0x24c   : > { %vm610_vm4 = vcmp.eq.f32.partialorder %v607_v25, %v609_v27  ;;  %v615_v34 = vcvt.f32.s32 %v609_v27  ;;  %v1198_v27 = vld [vmem:[%s1507_s26 + $0x18] sm:$0xff]   ;;  %s484_s26 = scalar_lea.vmem %s1613_s7, %s1462_s25 }
 0x24d   : > { %v611_v29 = vsel %vm610_vm4, %v606_v28, inf  ;;  %1096 = vmatpush3.bf16.msra.mxu1 %v1198_v27 }
 0x24e   : > { %612 = vmin.xlane.f32.xlu1 %v611_v29  ;;  %v616_v37 = vshll.u32 %v615_v34, 16 }
 0x2db   : > { %v613_v36 = vpop.xlane.xlu1 %612 }
 0x2dc   : > { %v614_v38 = vcvt.f32.s32 %v613_v36 }
 0x2de   : > { %v617_v40 = vadd.s32 %v616_v37, %v614_v38 }
 0x2e0   : > { %v618_v41 = vrot.slane %v617_v40, 7 }
 0x2e2   : > { %v620_v42 = vsel %vm619_vm5, 0, %v618_v41 }
 0x2e3   : > { %v621_v43 = vmul.u32 64, %v620_v42 }
 0x2e5   : > { %v622_v45 = vadd.s32 %v621_v43, %v617_v40 }
 0x2e7   : > { %v624_v46 = vmul.u32 %v623_v44, %v622_v45 }
 0x2e9   : > { %v625_v47 = vadd.s32 %v624_v46, %v623_v44 }
 0x2eb   : > { %v627_v49 = vcvt.s32.f32 %v625_v47 }
 0x2ed   : > { %v630_v50 = vmul.f32 %v1200_v48, %v627_v49 }
 0x2ef   : > { %v631_v51 = vfloor.f32 %v630_v50 }
 0x2f1   : > { %v1101_v52 = vtrunc.f32 %v631_v51 }
 0x2f3   : > { %v1102_v54 = vcvt.f32.s32 %v1101_v52 }
 0x2f5   : > { %v634_v55 = vmul.u32 %v1102_v54, %v633_v53 }
 0x2f7   : > { %v635_v56 = vsub.s32 %v625_v47, %v634_v55 }
 0x2f9   : > { %v636_v57 = vcvt.s32.f32 %v635_v56 }
 0x2fb   : > { %v637_v58 = vmul.f32 %v1200_v48, %v636_v57 }
 0x2fd   : > { %v638_v59 = vfloor.f32 %v637_v58 }
 0x2ff   : > { %v1103_v60 = vtrunc.f32 %v638_v59 }
 0x301   : > { %v1104_v61 = vcvt.f32.s32 %v1103_v60 }
 0x303   : > { %v640_v62 = vmul.u32 %v1104_v61, %v633_v53 }
 0x305   : > { %v641_v63 = vsub.s32 %v635_v56, %v640_v62  ;;  %v843_v56 = vld [vmem:[%s491_s11] sm:$0xff]  ;;  %s452_s11 = sand.u32 1, %s1293_s19  }
 0x307   : > { %vm642_vm6 = vcmp.lt.s32.totalorder %v641_v63, 0  ;;  %v643_v1 = vadd.s32 %v641_v63, %v633_v53 }
 0x309   : > { %v644_v2 = vsel %vm642_vm6, %v643_v1, %v641_v63 }
 0x30a   : > { %vm645_vm7 = vcmp.ge.s32.totalorder %v644_v2, %v633_v53  ;;  %v646_v3 = vsub.s32 %v644_v2, %v633_v53 }
 0x30c   : > { %v647_v4 = vsel %vm645_vm7, %v646_v3, %v644_v2  ;;  %v1056_v2 = vld [vmem:[%s478_s29] ss:$0 sm:$0xff]  ;;  %s487_s29 = scalar_lea.vmem %s1614_s8, %s1462_s25 }
 0x30d   : > { %v648_v5 = vcvt.s32.f32 %v647_v4 }
 0x30f   : > { %v650_v6 = vmul.f32 0.0009765625, %v648_v5 }
 0x311   : > { %v651_v7 = vfloor.f32 %v650_v6 }
 0x313   : > { %v1105_v8 = vtrunc.f32 %v651_v7 }
 0x315   : > { %v1106_v10 = vcvt.f32.s32 %v1105_v8 }
 0x317   : > { %v653_v11 = vmul.u32 1024, %v1106_v10 }
 0x319   : > { %v654_v12 = vsub.s32 %v647_v4, %v653_v11 }
 0x31b   : > { %v655_v13 = vcvt.s32.f32 %v654_v12 }
 0x31d   : > { %v656_v14 = vmul.f32 0.0009765625, %v655_v13 }
 0x31f   : > { %v657_v15 = vfloor.f32 %v656_v14 }
 0x321   : > { %v1107_v16 = vtrunc.f32 %v657_v15 }
 0x323   : > { %v1108_v17 = vcvt.f32.s32 %v1107_v16 }
 0x325   : > { %v659_v18 = vmul.u32 1024, %v1108_v17 }
 0x327   : > { %v660_v19 = vsub.s32 %v654_v12, %v659_v18  ;;  %v1058_v18 = vld [vmem:[%s484_s26] ss:$0 sm:$0xff] }
 0x329   : > { %vm661_vm8 = vcmp.lt.s32.totalorder %v660_v19, 0  ;;  %v662_v21 = vadd.s32 1024, %v660_v19 }
 0x32b   : > { %v663_v22 = vsel %vm661_vm8, %v662_v21, %v660_v19  ;;  %v1059_v21 = vld [vmem:[%s487_s29] ss:$0 sm:$0xff]  ;;  %s1227_s29 = scalar_lea.vmem %s1226_s16, 256 }
 0x32c   : > { %vm664_vm9 = vcmp.ge.s32.totalorder %v663_v22, 1024  ;;  %v1049_v23 = vadd.s32 4294966272, %v663_v22 }
 0x32e   : > { %v666_v24 = vsel %vm664_vm9, %v1049_v23, %v663_v22 }
 0x32f   : > { %v668_v25 = vand.u32 15, %v666_v24  ;;  %v667_v26 = vshra.s32 %v666_v24, 4 }
 0x331   : > { %752 = vperm.xlu0 %1190, %v668_v25   ;;  %670 = vperm.xlu1 %1189, %v667_v26  }
 0x3b0   : > { %v671_v28 = vpop.permute.xlu1 %670  ;;  %v753_v32 = vpop.permute.xlu0 %752 }
 0x3b1   : > { %vm672_vm10 = vcmp.eq.s32.totalorder %v1498_v20, %v671_v28  ;;  %vm754_vm11 = vcmp.eq.s32.totalorder %v501_v31, %v753_v32  ;;  %v806_v20 = vsel %vm532_vm1, %v1488_v9, 0.0 }
 0x3b2   : > { %v1050_v29 = vsel %vm672_vm10, 1.0, %v1320_v0  ;;  %807 = vadd.xlane.f32.xlu0 %v806_v20 }
 0x3b3   : > { %v675_v30 = vpack.c.bf16 %v1050_v29, %v1050_v29 }
 0x3b5   : > { %1098 = vmatmul.mubr.msk.bf16.vlgmr.msra.gmra.mrb[0].mxu1 %vm597_vm2, %v675_v30  ;;  %vm848_vm2 = vcmask 195584  }
 0x43f   : > { %v808_v46 = vpop.xlane.xlu0 %807 }
 0x440   : > { %v810_v47 = vmul.f32 0.03125, %v808_v46 }
 0x442   : > { %v811_v50 = vsub.f32 %v1488_v9, %v810_v47 }
 0x444   : > { %v812_v53 = vmul.f32 %v811_v50, %v811_v50 }
 0x446   : > { %v813_v55 = vsel %vm532_vm1, %v812_v53, 0.0 }
 0x488   : > { %v745_v33 = vpop.f32.mrb[0].mxu1 }
 0x489   : > { %v755_v34 = vsel %vm754_vm11, %v745_v33, 0.0  ;;  %v1099_v35 = vpop.f32.mrb[1].mxu1 }
 0x48a   : > { %756 = vrot.lane.b32.xlu1 %v755_v34, %s1323_s21  ;;  %v748_v36 = vpop.f32.mrb[2].mxu1  ;;  %s1035_s21 = sshll.u32 %s452_s11, 3 }
 0x48b   : > { %v1100_v37 = vpop.f32.mrb[3].mxu1 }
 0x4fc   : > { %v757_v38 = vpop.permute.xlu1 %756 }
 0x4fd   : > { %v758_v39 = vadd.f32 %v757_v38, %v755_v34 }
 0x4ff   : > { %759 = vrot.lane.b32.xlu1 %v758_v39, %s1324_s30  ;;  %s1062_s30 = sshll.u32 %s1477_s15, 7 }
 0x500   : > { %s1552_s26 = scalar_lea.hbm %s1616_s10, %s1062_s30 }
 0x571   : > { %v760_v40 = vpop.permute.xlu1 %759 }
 0x572   : > { %v761_v0 = vadd.f32 %v760_v40, %v758_v39 }
 0x574   : > { %762 = vrot.lane.b32.xlu1 %v761_v0, %s1325_s12  ;;  %s481_s12 = scalar_lea.vmem %s1612_s6, %s1462_s25  ;;  %s858_s25 = scalar_lea.sflag [#allocation5], %s452_s11 }
 0x575   : > { %v1057_v4 = vld [vmem:[%s481_s12] ss:$0 sm:$0xff]  ;;  %s454_s12 = scalar_lea.vmem [#allocation4], %s1035_s21 }
 0x5e6   : > { %v763_v41 = vpop.permute.xlu1 %762 }
 0x5e7   : > { %v764_v42 = vadd.f32 %v763_v41, %v761_v0 }
 0x5e9   : > { %765 = vrot.lane.b32.xlu1 %v764_v42, %s1326_s2  ;;  %s1327_s2 = smov 24  }
 0x65b   : > { %v766_v43 = vpop.permute.xlu1 %765 }
 0x65c   : > { %v767_v44 = vadd.f32 %v766_v43, %v764_v42 }
 0x65e   : > { %v769_v45 = vsel %vm768_vm12, %v767_v44, 0.0 }
 0x65f   : > { %770 = vadd.xlane.f32.xlu1 %v769_v45 }
 0x6ec   : > { %v771_v48 = vpop.xlane.xlu1 %770 }
 0x6ed   : > { %v773_v49 = vmul.f32 0.125, %v771_v48 }
 0x6ef   : > { %v774_v51 = vsub.f32 %v767_v44, %v773_v49 }
 0x6f1   : > { %v775_v52 = vmul.f32 %v774_v51, %v774_v51 }
 0x6f3   : > { %v776_v54 = vsel %vm768_vm12, %v775_v52, 0.0 }
 0x6f4   : > { %777 = vadd.xlane.f32.xlu1 %v776_v54 }
 0x6f8   : > { %814 = vadd.xlane.f32.xlu1 %v813_v55 }
 0x709   : > { %852 = vperm.xlu1 %1189, %v843_v56  }
 0x781   : > { %v778_v9 = vpop.xlane.xlu1 %777 }
 0x782   : > { %v779_v57 = vmul.f32 0.125, %v778_v9 }
 0x784   : > { %1201 = vrsqrt.f32 %v779_v57  ;;  %vm782_vm13 = vcmp.eq.f32.partialorder %v779_v57, inf  ;;  %v785_v60 = vand.u32 2147483648, %v779_v57  ;;  %vm784_vm14 = vcmp.eq.f32.partialorder %v779_v57, 0.0 }
 0x785   : > { %v815_v7 = vpop.xlane.xlu1 %814 }
 0x786   : > { %v816_v8 = vmul.f32 0.03125, %v815_v7 }
 0x788   : > { %vm819_vm15 = vcmp.eq.f32.partialorder %v816_v8, inf  ;;  %v822_v12 = vand.u32 2147483648, %v816_v8  ;;  %vm821_vm0 = vcmp.eq.f32.partialorder %v816_v8, 0.0 }
 0x789   : > { %v853_v24 = vpop.permute.xlu1 %852 }
 0x78e   : > { %v1202_v58 = vpop.eup %1201 }
 0x78f   : > { %v781_v59 = vmul.f32 %v1202_v58, %v779_v57 }
 0x791   : > { %v783_v61 = vsel %vm782_vm13, %v779_v57, %v781_v59 }
 0x792   : > { %v786_v62 = vsel %vm784_vm14, %v785_v60, %v783_v61 }
 0x793   : > { %v787_v63 = vadd.f32 1e-05, %v786_v62 }
 0x795   : > { %1203 = vrcp.f32 %v787_v63 }
 0x796   : > { %1205 = vrsqrt.f32 %v816_v8 }
 0x79f   : > { %v1204_v1 = vpop.eup %1203 }
 0x7a0   : > { %v789_v3 = vmul.f32 %v1204_v1, %v774_v51  ;;  %v1206_v10 = vpop.eup %1205 }
 0x7a1   : > { %v818_v11 = vmul.f32 %v1206_v10, %v816_v8 }
 0x7a2   : > { %v797_v5 = vmul.f32 %v1056_v2, %v789_v3 }
 0x7a3   : > { %v820_v13 = vsel %vm819_vm15, %v816_v8, %v818_v11 }
 0x7a4   : > { %v805_v6 = vadd.f32 %v1057_v4, %v797_v5  ;;  %v823_v14 = vsel %vm821_vm0, %v822_v12, %v820_v13 }
 0x7a5   : > { %v824_v15 = vadd.f32 1e-05, %v823_v14 }
 0x7a6   : > { %845 = vrot.lane.b32.xlu0 %v805_v6, %s1327_s2  ;;  %s873_s2 = sshll.u32 %s454_s12, 4  ;;  %s1554_s2 = int_to_ptr.vmem [resolvable:$true] %s873_s2 }
 0x7a7   : > { %1207 = vrcp.f32 %v824_v15  ;;  %s1221_s15 = scalar_lea.vmem %s1554_s2, 128  ;;  %p1228_p9 = scmp.lt.s32.totalorder %s1554_s2, %s1226_s16 }
 0x7a8   : > { %p1222_p6 = scmp.ne.s32.totalorder %s1554_s2, %s1221_s15  ;;  %p1229_p10 = scmp.lt.s32.totalorder %s1227_s29, %s1221_s15 }
 0x7aa   : > { %p1223_p7 = pnand %p1222_p6, %p1444_p11  ;;  %p1230_p13 = por %p1229_p10, %p1228_p9 }
 0x7ac   : > { %p1224_p8 = pneg %p1223_p7 }
 0x7ae   : > { %p1231_p0 = pnand %p1230_p13, %p1224_p8 }
 0x7b1   : > { %v1208_v16 = vpop.eup %1207 }
 0x7b2   : > { %v826_v17 = vmul.f32 %v1208_v16, %v811_v50 }
 0x7b4   : > { %v834_v19 = vmul.f32 %v1058_v18, %v826_v17 }
 0x7b6   : > { %v842_v22 = vadd.f32 %v1059_v21, %v834_v19 }
 0x818   : > { %v846_v23 = vpop.permute.xlu0 %845 }
 0x819   : > { %v849_v25 = vsel %vm848_vm2, %v842_v22, %v846_v23 }
 0x81a   : > { %v855_v26 = vmul.f32 %v853_v24, %v849_v25 }
 0x81c   : > { %856 = vst.msk [vmem:[%s454_s12] sm:$0xff] %vm532_vm1, %v855_v26 }
 0x81d   : > { %1234 = shalt.err (!%p1231_p0)
}
 0x81e   : > { %s1235_s11 = scalar_lea.hbm %s1552_s26, 128  ;;  %s1239_s12 = scalar_lea.hbm %s1616_s10, 512 }
 0x81f   : > { %p1236_p1 = scmp.ne.s32.totalorder %s1552_s26, %s1235_s11  ;;  %p1240_p4 = scmp.lt.u32.totalorder %s1552_s26, %s1616_s10 }
 0x820   : > { %p1241_p5 = scmp.lt.u32.totalorder %s1239_s12, %s1235_s11  ;;  %p1243_p7 = scmp.lt.u32.totalorder %s1235_s11, %s1552_s26 }
 0x821   : > { %p1237_p2 = pnand %p1236_p1, %p1444_p11 }
 0x822   : > { %p1242_p6 = por %p1241_p5, %p1240_p4 }
 0x823   : > { %p1238_p3 = pneg %p1237_p2 }
 0x824   : > { %p1244_p8 = por %p1243_p7, %p1242_p6 }
 0x826   : > { %p1245_p9 = pnand %p1244_p8, %p1238_p3 }
 0x828   : > { %1248 = shalt.err (!%p1245_p9)
}
 0x829   : > { %1109 = dma.vmem_to_hbm [thread:$0]  (%p1444_p11), %s1554_s2, 128, %s1552_s26, %s858_s25  }
 0x82a PF: > { %p1115_p10 = scmp.ge.s32.totalorder %s1317_s24, 2  ;;  %s885_s15 = sand.u32 1, %s1289_s18  }
 0x82b   : > { %s886_s20 = scalar_lea.sflag [#allocation5], %s885_s15 }
 0x82c   : > { %p1112_p13 = pnand %p1115_p10, %p1448_p12 }
 0x82e   : > { %1284 = dma.done.wait (!%p1112_p13), %s886_s20, 128  }
 0x82f   : > { %1286 = vsyncadd (!%p1112_p13), %s886_s20, 4294967168  ;;  %s29_s24 = sadd.s32 1, %s1317_s24   ;;  %s1627_s13 = sld [smem:[#allocation8_spill]] }
 0x830   : > { %p26_p0 = scmp.ge.s32.totalorder %s29_s24, 6   ;;  %s1628_s2 = sld [smem:[#allocation9_spill]] }
 0x831   : > { %s1629_s18 = smov %s1293_s19  ;;  %s1630_s19 = smov %s1297_s0 }
 0x832   : > { %s1631_s0 = smov %s1456_s17  ;;  %s1632_s20 = smov %s1309_s22 }
 0x833   : > { %s1633_s21 = smov %s1313_s23  ;;  %28 = sbr.rel (!%p26_p0) target bundleno = 20 (0x14), region = 115 }
 0x835   : > { %s1634_s22 = smov %s1627_s13 }
 0x836   : > { %s1635_s23 = smov %s1628_s2 }
 0x83a   :  { %891 = vsyncpa [#allocation5], 1 }
 0x83b   :  { %893 = vsyncpa [#allocation5 + $0x1], 1 }

</bundles_post_ra>
